<compile_context>
chip_gen: v5e
topology: v5e:2x2
jax: 0.10.0
libtpu: 0.0.40
codegen_flags: <defaults>
</compile_context>

<pallas_src>
import functools
import math

import jax
import jax.numpy as jnp
from jax.experimental import pallas as pl
from jax.experimental.pallas import tpu as pltpu

_BN_EPS = 1e-5
_TM_MAX = 512  # row tile for large N (multiple of 8, VMEM-safe on v7x's 64 MiB)


def _round_up(x, m):
    return (x + m - 1) // m * m


# ---------------------------------------------------------------------------
# Fused Pallas kernel
# ---------------------------------------------------------------------------

def _fused_kernel(x_ref, w1_ref, s1_ref, w2_ref, b2_ref, wf_ref, bf_ref,
                  out_ref):
    # Layer 1 for all three modalities at once (block-diagonal W1, BN folded in)
    h = jnp.dot(x_ref[...], w1_ref[...],
                preferred_element_type=jnp.float32) + s1_ref[...]
    h = jnp.maximum(h, 0.0)                      # ReLU (Dropout = identity, eval)
    # Layer 2 for all three modalities (block-diagonal W2) -> [f | m | o]
    fmo = jnp.dot(h, w2_ref[...],
                  preferred_element_type=jnp.float32) + b2_ref[...]
    # Final combined matmul: columns [0:out) = embeddings Linear applied to the
    # (implicit) concat; columns [out:2*out) = identity copy of the object
    # block.  One lane-dense store of the whole [tm, 2*out] slab.
    out_ref[...] = (jnp.dot(fmo, wf_ref[...],
                            preferred_element_type=jnp.float32)
                    + bf_ref[...]).astype(out_ref.dtype)


def _fused_call(x, fused, tm):
    np_rows, kp = x.shape
    h1 = fused["W1"].shape[1]
    h2 = fused["W2"].shape[1]
    wout = fused["Wf"].shape[1]
    grid = (np_rows // tm,)

    flops = 2 * np_rows * (kp * h1 + h1 * h2 + h2 * wout)
    bytes_accessed = 4 * (x.size + fused["W1"].size + fused["S1"].size
                          + fused["W2"].size + fused["B2"].size
                          + fused["Wf"].size + fused["Bf"].size
                          + np_rows * wout)

    return pl.pallas_call(
        _fused_kernel,
        out_shape=jax.ShapeDtypeStruct((np_rows, wout), jnp.float32),
        grid=grid,
        in_specs=[
            pl.BlockSpec((tm, kp), lambda i: (i, 0)),      # packed activations
            pl.BlockSpec((kp, h1), lambda i: (0, 0)),      # block-diag W1 (VMEM-resident)
            pl.BlockSpec((1, h1), lambda i: (0, 0)),       # folded BN shift (+b1)
            pl.BlockSpec((h1, h2), lambda i: (0, 0)),      # block-diag W2
            pl.BlockSpec((1, h2), lambda i: (0, 0)),       # b2 (packed)
            pl.BlockSpec((h2, wout), lambda i: (0, 0)),    # [emb_w | object-select]
            pl.BlockSpec((1, wout), lambda i: (0, 0)),     # [emb_b | 0]
        ],
        out_specs=pl.BlockSpec((tm, wout), lambda i: (i, 0)),
        compiler_params=pltpu.CompilerParams(
            dimension_semantics=("parallel",)),
        cost_estimate=pl.CostEstimate(flops=flops, transcendentals=0,
                                      bytes_accessed=bytes_accessed),
    )(x, fused["W1"], fused["S1"], fused["W2"], fused["B2"],
      fused["Wf"], fused["Bf"])


# ---------------------------------------------------------------------------
# Parameter construction (deterministic, synthetic, torch-layout equivalents)
# ---------------------------------------------------------------------------

def _init_linear(key, in_dim, out_dim):
    kw, kb = jax.random.split(key)
    bound = 1.0 / math.sqrt(in_dim)
    w = jax.random.uniform(kw, (in_dim, out_dim), jnp.float32, -bound, bound)
    b = jax.random.uniform(kb, (1, out_dim), jnp.float32, -bound, bound)
    return w, b


def _init_proj(key, in_dim, out_dim):
    k1, k2, k3, k4, k5, k6 = jax.random.split(key, 6)
    w1, b1 = _init_linear(k1, in_dim, 2 * out_dim)
    w2, b2 = _init_linear(k2, 2 * out_dim, out_dim)
    # BatchNorm1d eval-mode parameters / running stats (non-trivial on purpose).
    gamma = 1.0 + 0.1 * jax.random.normal(k3, (1, 2 * out_dim), jnp.float32)
    beta = 0.05 * jax.random.normal(k4, (1, 2 * out_dim), jnp.float32)
    mean = 0.1 * jax.random.normal(k5, (1, 2 * out_dim), jnp.float32)
    var = jax.random.uniform(k6, (1, 2 * out_dim), jnp.float32, 0.5, 1.5)
    return dict(w1=w1, b1=b1, gamma=gamma, beta=beta, mean=mean, var=var,
                w2=w2, b2=b2)


def make_params(key, in_dim, motion_in_dim, object_in_dim, out_dim,
                concat_method):
    ks = jax.random.split(key, 4)
    embeddings_dim = 3 * out_dim if concat_method == "concat" else 2 * out_dim
    we, be = _init_linear(ks[3], embeddings_dim, out_dim)
    return dict(
        feats=_init_proj(ks[0], in_dim, out_dim),
        motion=_init_proj(ks[1], motion_in_dim, out_dim),
        object=_init_proj(ks[2], object_in_dim, out_dim),
        emb_w=we, emb_b=be,
    )


def build_fused_params(raw, in_dims, out_dim, concat_method="concat"):
    """Fold BN into Linear1, build block-diagonal weights and the combined
    final weight for the single fused kernel."""
    k_total = sum(in_dims)
    kp = _round_up(k_total, 128)           # lane-dense packed input width
    h1 = 3 * 2 * out_dim
    h2 = 3 * out_dim

    w1_full = jnp.zeros((kp, h1), jnp.float32)
    w2_full = jnp.zeros((h1, h2), jnp.float32)
    s1_parts, b2_parts = [], []
    row = 0
    for idx, name in enumerate(("feats", "motion", "object")):
        p = raw[name]
        scale = p["gamma"] / jnp.sqrt(p["var"] + _BN_EPS)      # [1, 2*out]
        shift = p["beta"] - p["mean"] * scale
        w1_eff = p["w1"] * scale                               # fold BN scale
        s1_eff = p["b1"] * scale + shift                       # fold b1 + shift
        in_d = in_dims[idx]
        w1_full = w1_full.at[row:row + in_d,
                             idx * 2 * out_dim:(idx + 1) * 2 * out_dim].set(w1_eff)
        w2_full = w2_full.at[idx * 2 * out_dim:(idx + 1) * 2 * out_dim,
                             idx * out_dim:(idx + 1) * out_dim].set(p["w2"])
        s1_parts.append(s1_eff)
        b2_parts.append(p["b2"])
        row += in_d

    s1_full = jnp.concatenate(s1_parts, axis=-1)               # [1, h1]
    b2_full = jnp.concatenate(b2_parts, axis=-1)               # [1, h2]

    # Combined final weight [h2, 2*out]:
    #   cols [0:out)      -> embeddings Linear on the concatenated [f|m|o]
    #   cols [out:2*out)  -> identity on the object block (emits OBJECT_ATT_FEATS)
    wf = jnp.zeros((h2, 2 * out_dim), jnp.float32)
    if concat_method == "concat":
        wf = wf.at[:, :out_dim].set(raw["emb_w"])              # emb_w: [3*out, out]
    elif concat_method == "transformer":
        # emb_w: [2*out, out]; object block contributes nothing to embeddings.
        wf = wf.at[:2 * out_dim, :out_dim].set(raw["emb_w"])
    else:
        raise ValueError(concat_method)
    wf = wf.at[2 * out_dim:, out_dim:].set(jnp.eye(out_dim, dtype=jnp.float32))
    bf = jnp.concatenate([raw["emb_b"],
                          jnp.zeros((1, out_dim), jnp.float32)], axis=-1)

    return dict(W1=w1_full, S1=s1_full, W2=w2_full, B2=b2_full, Wf=wf, Bf=bf)


# ---------------------------------------------------------------------------
# Forward wrapper (mirrors ConcatVisualBaseEmbedding.forward, eval mode)
# ---------------------------------------------------------------------------

@functools.partial(jax.jit, static_argnames=("concat_method",))
def concat_visual_base_embedding(feats, motion_feats, object_feats, fused,
                                 concat_method="concat"):
    bsz, sample_numb, _ = feats.shape
    max_objects = object_feats.shape[1]
    # The fused kernel packs the three modalities row-wise, which requires the
    # same sequence length ('concat' already requires this for torch.cat).
    # TODO(synk): 'transformer' with sample_numb != max_objects would need a
    # separate (small) kernel invocation for the object projection.
    assert sample_numb == max_objects

    out_dim = fused["Wf"].shape[1] // 2          # static
    kp = fused["W1"].shape[0]                    # static padded input width

    x = jnp.concatenate(
        [feats.reshape(bsz * sample_numb, -1),
         motion_feats.reshape(bsz * sample_numb, -1),
         object_feats.reshape(bsz * max_objects, -1)], axis=-1)
    n = x.shape[0]

    tm = _round_up(n, 8) if n <= _TM_MAX else _TM_MAX
    np_rows = _round_up(n, tm)
    x = jnp.pad(x, ((0, np_rows - n), (0, kp - x.shape[1])))

    slab = _fused_call(x, fused, tm)             # [np_rows, 2*out_dim]
    emb = slab[:n, :out_dim].reshape(bsz, sample_numb, out_dim)
    obj = slab[:n, out_dim:].reshape(bsz, max_objects, out_dim)

    # embeddings_pos / act / norm / dropout are None in this configuration.
    return {"ATT_FEATS": emb, "OBJECT_ATT_FEATS": obj}


# ---------------------------------------------------------------------------
# Pure-jnp reference (unfused, straight from the torch-style parameters)
# ---------------------------------------------------------------------------

def _ref_proj(x, p):
    x2d = x.reshape(-1, x.shape[-1])
    h = x2d @ p["w1"] + p["b1"]
    h = (h - p["mean"]) / jnp.sqrt(p["var"] + _BN_EPS) * p["gamma"] + p["beta"]
    h = jnp.maximum(h, 0.0)
    return h @ p["w2"] + p["b2"]


def reference(feats, motion_feats, object_feats, raw, concat_method):
    bsz, sample_numb = feats.shape[0], motion_feats.shape[1]
    max_objects = object_feats.shape[1]
    f = _ref_proj(feats, raw["feats"]).reshape(bsz, sample_numb, -1)
    m = _ref_proj(motion_feats, raw["motion"]).reshape(bsz, sample_numb, -1)
    o = _ref_proj(object_feats, raw["object"]).reshape(bsz, max_objects, -1)
    if concat_method == "concat":
        content = jnp.concatenate([f, m, o], axis=-1)
    else:
        content = jnp.concatenate([f, m], axis=-1)
    emb = content @ raw["emb_w"] + raw["emb_b"]
    return emb, o


# ---------------------------------------------------------------------------

if __name__ == "__main__":
    key = jax.random.PRNGKey(0)
    k_feat, k_mot, k_obj, k_par = jax.random.split(key, 4)

    # Small shapes consistent with the module ('concat' needs equal seq lens).
    bsz, sample_numb, max_objects = 2, 8, 8
    in_dim, motion_in_dim, object_in_dim, out_dim = 32, 48, 24, 64
    concat_method = "concat"

    feats = jax.random.normal(k_feat, (bsz, sample_numb, in_dim), jnp.float32)
    motion_feats = jax.random.normal(k_mot, (bsz, sample_numb, motion_in_dim),
                                     jnp.float32)
    object_feats = jax.random.normal(k_obj, (bsz, max_objects, object_in_dim),
                                     jnp.float32)

    raw = make_params(k_par, in_dim, motion_in_dim, object_in_dim, out_dim,
                      concat_method)
    fused = build_fused_params(raw, (in_dim, motion_in_dim, object_in_dim),
                               out_dim, concat_method)

    out = concat_visual_base_embedding(feats, motion_feats, object_feats,
                                       fused, concat_method=concat_method)
    jax.block_until_ready(out)

    ref_emb, ref_obj = reference(feats, motion_feats, object_feats, raw,
                                 concat_method)
    assert out["ATT_FEATS"].shape == (bsz, sample_numb, out_dim)
    assert out["OBJECT_ATT_FEATS"].shape == (bsz, max_objects, out_dim)
    assert jnp.allclose(out["ATT_FEATS"], ref_emb, atol=1e-4, rtol=1e-4)
    assert jnp.allclose(out["OBJECT_ATT_FEATS"], ref_obj, atol=1e-4, rtol=1e-4)

    print("KERNEL_OK")
</pallas_src>

<mosaic_0001>
module attributes {stable_mosaic.version = 11 : i64} {
  func.func @_fused_kernel(%arg0: i32, %arg1: memref<16x128xf32, #tpu.memory_space<vmem>>, %arg2: memref<128x384xf32, #tpu.memory_space<vmem>>, %arg3: memref<1x384xf32, #tpu.memory_space<vmem>>, %arg4: memref<384x192xf32, #tpu.memory_space<vmem>>, %arg5: memref<1x192xf32, #tpu.memory_space<vmem>>, %arg6: memref<192x128xf32, #tpu.memory_space<vmem>>, %arg7: memref<1x128xf32, #tpu.memory_space<vmem>>, %arg8: memref<16x128xf32, #tpu.memory_space<vmem>>) attributes {dimension_semantics = [#tpu.dimension_semantics<parallel>], iteration_bounds = array<i64: 1>, scalar_prefetch = 0 : i64, scratch_operands = 0 : i64, tpu.core_type = #tpu.core_type<tc>, window_params = [{transform_indices = @transform_0, window_bounds = array<i64: 16, 128>}, {pipeline_mode = #tpu.pipeline_mode<synchronous>, transform_indices = @transform_1, window_bounds = array<i64: 128, 384>}, {pipeline_mode = #tpu.pipeline_mode<synchronous>, transform_indices = @transform_2, window_bounds = array<i64: 1, 384>}, {pipeline_mode = #tpu.pipeline_mode<synchronous>, transform_indices = @transform_3, window_bounds = array<i64: 384, 192>}, {pipeline_mode = #tpu.pipeline_mode<synchronous>, transform_indices = @transform_4, window_bounds = array<i64: 1, 192>}, {pipeline_mode = #tpu.pipeline_mode<synchronous>, transform_indices = @transform_5, window_bounds = array<i64: 192, 128>}, {pipeline_mode = #tpu.pipeline_mode<synchronous>, transform_indices = @transform_6, window_bounds = array<i64: 1, 128>}, {transform_indices = @transform_7, window_bounds = array<i64: 16, 128>}]} {
    %c0 = arith.constant 0 : index
    %c0_0 = arith.constant 0 : index
    %0 = vector.load %arg1[%c0, %c0_0] : memref<16x128xf32, #tpu.memory_space<vmem>>, vector<16x128xf32>
    %c0_1 = arith.constant 0 : index
    %c0_2 = arith.constant 0 : index
    %1 = vector.load %arg2[%c0_1, %c0_2] : memref<128x384xf32, #tpu.memory_space<vmem>>, vector<128x384xf32>
    %cst = arith.constant dense<0.000000e+00> : vector<16x384xf32>
    %2 = tpu.matmul %0, %1, %cst {dimension_numbers = #tpu.dot_dimension_numbers<[1], [0], [0], [1], [0, 0, 1, 1], [], []>} : vector<16x128xf32>, vector<128x384xf32>, vector<16x384xf32> -> vector<16x384xf32>
    %c0_3 = arith.constant 0 : index
    %c0_4 = arith.constant 0 : index
    %3 = vector.load %arg3[%c0_3, %c0_4] : memref<1x384xf32, #tpu.memory_space<vmem>>, vector<1x384xf32>
    %4 = vector.broadcast %3 : vector<1x384xf32> to vector<16x384xf32>
    %5 = arith.addf %2, %4 : vector<16x384xf32>
    %cst_5 = arith.constant 0.000000e+00 : f32
    %6 = vector.broadcast %cst_5 : f32 to vector<16x384xf32>
    %7 = arith.maximumf %5, %6 : vector<16x384xf32>
    %c0_6 = arith.constant 0 : index
    %c0_7 = arith.constant 0 : index
    %8 = vector.load %arg4[%c0_6, %c0_7] : memref<384x192xf32, #tpu.memory_space<vmem>>, vector<384x192xf32>
    %cst_8 = arith.constant dense<0.000000e+00> : vector<16x192xf32>
    %9 = tpu.matmul %7, %8, %cst_8 {dimension_numbers = #tpu.dot_dimension_numbers<[1], [0], [0], [1], [0, 0, 1, 1], [], []>} : vector<16x384xf32>, vector<384x192xf32>, vector<16x192xf32> -> vector<16x192xf32>
    %c0_9 = arith.constant 0 : index
    %c0_10 = arith.constant 0 : index
    %10 = vector.load %arg5[%c0_9, %c0_10] : memref<1x192xf32, #tpu.memory_space<vmem>>, vector<1x192xf32>
    %11 = vector.broadcast %10 : vector<1x192xf32> to vector<16x192xf32>
    %12 = arith.addf %9, %11 : vector<16x192xf32>
    %c0_11 = arith.constant 0 : index
    %c0_12 = arith.constant 0 : index
    %13 = vector.load %arg6[%c0_11, %c0_12] : memref<192x128xf32, #tpu.memory_space<vmem>>, vector<192x128xf32>
    %cst_13 = arith.constant dense<0.000000e+00> : vector<16x128xf32>
    %14 = tpu.matmul %12, %13, %cst_13 {dimension_numbers = #tpu.dot_dimension_numbers<[1], [0], [0], [1], [0, 0, 1, 1], [], []>} : vector<16x192xf32>, vector<192x128xf32>, vector<16x128xf32> -> vector<16x128xf32>
    %c0_14 = arith.constant 0 : index
    %c0_15 = arith.constant 0 : index
    %15 = vector.load %arg7[%c0_14, %c0_15] : memref<1x128xf32, #tpu.memory_space<vmem>>, vector<1x128xf32>
    %16 = vector.broadcast %15 : vector<1x128xf32> to vector<16x128xf32>
    %17 = arith.addf %14, %16 : vector<16x128xf32>
    %c0_16 = arith.constant 0 : index
    %c0_17 = arith.constant 0 : index
    %18 = vector.load %arg8[%c0_16, %c0_17] : memref<16x128xf32, #tpu.memory_space<vmem>>, vector<16x128xf32>
    tpu.vector_store %arg8[%c0_16, %c0_17], %17 {strides = array<i32>} : memref<16x128xf32, #tpu.memory_space<vmem>>, vector<16x128xf32>,
    return
  }
  func.func @transform_0(%arg0: i32) -> (i32, i32) {
    %c0_i32 = arith.constant 0 : i32
    %c0_i32_0 = arith.constant 0 : i32
    return %arg0, %c0_i32 : i32, i32
  }
  func.func @transform_1(%arg0: i32) -> (i32, i32) {
    %c0_i32 = arith.constant 0 : i32
    %c0_i32_0 = arith.constant 0 : i32
    %c0_i32_1 = arith.constant 0 : i32
    return %c0_i32, %c0_i32_0 : i32, i32
  }
  func.func @transform_2(%arg0: i32) -> (i32, i32) {
    %c0_i32 = arith.constant 0 : i32
    %c0_i32_0 = arith.constant 0 : i32
    %c0_i32_1 = arith.constant 0 : i32
    return %c0_i32, %c0_i32_0 : i32, i32
  }
  func.func @transform_3(%arg0: i32) -> (i32, i32) {
    %c0_i32 = arith.constant 0 : i32
    %c0_i32_0 = arith.constant 0 : i32
    %c0_i32_1 = arith.constant 0 : i32
    return %c0_i32, %c0_i32_0 : i32, i32
  }
  func.func @transform_4(%arg0: i32) -> (i32, i32) {
    %c0_i32 = arith.constant 0 : i32
    %c0_i32_0 = arith.constant 0 : i32
    %c0_i32_1 = arith.constant 0 : i32
    return %c0_i32, %c0_i32_0 : i32, i32
  }
  func.func @transform_5(%arg0: i32) -> (i32, i32) {
    %c0_i32 = arith.constant 0 : i32
    %c0_i32_0 = arith.constant 0 : i32
    %c0_i32_1 = arith.constant 0 : i32
    return %c0_i32, %c0_i32_0 : i32, i32
  }
  func.func @transform_6(%arg0: i32) -> (i32, i32) {
    %c0_i32 = arith.constant 0 : i32
    %c0_i32_0 = arith.constant 0 : i32
    %c0_i32_1 = arith.constant 0 : i32
    return %c0_i32, %c0_i32_0 : i32, i32
  }
  func.func @transform_7(%arg0: i32) -> (i32, i32) {
    %c0_i32 = arith.constant 0 : i32
    %c0_i32_0 = arith.constant 0 : i32
    return %arg0, %c0_i32 : i32, i32
  }
}

</mosaic_0001>

<bundles_post_ra>
// kernel: concat_visual_base_embedding.1
= control target key start
LH: loop header
LB: loop body
LE: loop exit
PB: predicated region body
PF: predicated region fallthrough
CT: control target
= control target key end

     0   :  { %vm427_vm0 = vcmask 523264   ;;  %s1134_s1 = inlined_call_operand.vmem [shape: f32[128,384], index: 1, kind: input, shape index: {}]   ;;  %s1135_s3 = inlined_call_operand.vmem [shape: f32[384,192], index: 3, kind: input, shape index: {}]   ;;  %s1136_s0 = inlined_call_operand.vmem [shape: f32[16,128], index: 0, kind: input, shape index: {}]   ;;  %s1137_s2 = inlined_call_operand.vmem [shape: f32[1,384], index: 2, kind: input, shape index: {}]   ;;  %s1138_s5 = inlined_call_operand.vmem [shape: f32[192,128], index: 5, kind: input, shape index: {}]   ;;  %s1139_s6 = inlined_call_operand.vmem [shape: f32[1,128], index: 6, kind: input, shape index: {}]   ;;  %s1140_s4 = inlined_call_operand.vmem [shape: f32[1,192], index: 4, kind: input, shape index: {}]   ;;  %s1141_s7 = inlined_call_operand.vmem [shape: f32[16,128], index: 7, kind: output, shape index: {}]  }
   0x1   :  { %v73_v0 = vld [vmem:[%s1134_s1 + $0x168] sm:$0xff]  ;;  %v70_v1 = vld [vmem:[%s1134_s1 + $0x150] sm:$0xff]  ;;  %v75_v2 = vld [vmem:[%s1134_s1 + $0x178] sm:$0xff] }
   0x2   :  { %84 = vmatpush.msra.mxu0 %v73_v0  ;;  %v72_v3 = vld [vmem:[%s1134_s1 + $0x160] sm:$0xff]  ;;  %v67_v4 = vld [vmem:[%s1134_s1 + $0x138] sm:$0xff]  ;;  %130 = vmatpush.msra.mxu2 %v75_v2  ;;  %v74_v5 = vld [vmem:[%s1134_s1 + $0x170] sm:$0xff] }
   0x3   :  { %107 = vmatpush.msra.mxu1 %v74_v5  ;;  %v69_v6 = vld [vmem:[%s1134_s1 + $0x148] sm:$0xff]  ;;  %v71_v7 = vld [vmem:[%s1134_s1 + $0x158] sm:$0xff]  ;;  %v64_v8 = vld [vmem:[%s1134_s1 + $0x120] sm:$0xff] }
   0x4   :  { %85 = vmatpush.msra.mxu0 %v70_v1  ;;  %131 = vmatpush.msra.mxu2 %v72_v3  ;;  %v68_v9 = vld [vmem:[%s1134_s1 + $0x140] sm:$0xff]  ;;  %v66_v10 = vld [vmem:[%s1134_s1 + $0x130] sm:$0xff]  ;;  %v61_v11 = vld [vmem:[%s1134_s1 + $0x108] sm:$0xff] }
   0x5   :  { %108 = vmatpush.msra.mxu1 %v71_v7  ;;  %v65_v12 = vld [vmem:[%s1134_s1 + $0x128] sm:$0xff]  ;;  %v63_v13 = vld [vmem:[%s1134_s1 + $0x118] sm:$0xff]  ;;  %v58_v14 = vld [vmem:[%s1134_s1 + $0xf0] sm:$0xff] }
   0x6   :  { %86 = vmatpush.msra.mxu0 %v67_v4  ;;  %132 = vmatpush.msra.mxu2 %v69_v6  ;;  %v62_v15 = vld [vmem:[%s1134_s1 + $0x110] sm:$0xff]  ;;  %v60_v16 = vld [vmem:[%s1134_s1 + $0x100] sm:$0xff]  ;;  %v55_v17 = vld [vmem:[%s1134_s1 + $0xd8] sm:$0xff] }
   0x7   :  { %109 = vmatpush.msra.mxu1 %v68_v9  ;;  %v59_v18 = vld [vmem:[%s1134_s1 + $0xf8] sm:$0xff]  ;;  %v57_v19 = vld [vmem:[%s1134_s1 + $0xe8] sm:$0xff]  ;;  %v52_v20 = vld [vmem:[%s1134_s1 + $0xc0] sm:$0xff] }
   0x8   :  { %87 = vmatpush.msra.mxu0 %v64_v8  ;;  %133 = vmatpush.msra.mxu2 %v66_v10  ;;  %v56_v21 = vld [vmem:[%s1134_s1 + $0xe0] sm:$0xff]  ;;  %v54_v22 = vld [vmem:[%s1134_s1 + $0xd0] sm:$0xff]  ;;  %v49_v23 = vld [vmem:[%s1134_s1 + $0xa8] sm:$0xff] }
   0x9   :  { %110 = vmatpush.msra.mxu1 %v65_v12  ;;  %v53_v24 = vld [vmem:[%s1134_s1 + $0xc8] sm:$0xff]  ;;  %v51_v25 = vld [vmem:[%s1134_s1 + $0xb8] sm:$0xff]  ;;  %v46_v26 = vld [vmem:[%s1134_s1 + $0x90] sm:$0xff] }
   0xa   :  { %88 = vmatpush.msra.mxu0 %v61_v11  ;;  %134 = vmatpush.msra.mxu2 %v63_v13  ;;  %v50_v27 = vld [vmem:[%s1134_s1 + $0xb0] sm:$0xff]  ;;  %v48_v29 = vld [vmem:[%s1134_s1 + $0xa0] sm:$0xff]  ;;  %v43_v31 = vld [vmem:[%s1134_s1 + $0x78] sm:$0xff] }
   0xb   :  { %111 = vmatpush.msra.mxu1 %v62_v15  ;;  %v189_v28 = vld [vmem:[%s1135_s3 + $0xf0] sm:$0xff]  ;;  %v187_v30 = vld [vmem:[%s1135_s3 + $0xe0] sm:$0xff]  ;;  %v47_v32 = vld [vmem:[%s1134_s1 + $0x98] sm:$0xff] }
   0xc   :  { %89 = vmatpush.msra.mxu0 %v58_v14  ;;  %135 = vmatpush.msra.mxu2 %v60_v16  ;;  %v45_v33 = vld [vmem:[%s1134_s1 + $0x88] sm:$0xff]  ;;  %v185_v34 = vld [vmem:[%s1135_s3 + $0xd0] sm:$0xff]  ;;  %v40_v35 = vld [vmem:[%s1134_s1 + $0x60] sm:$0xff] }
   0xd   :  { %112 = vmatpush.msra.mxu1 %v59_v18  ;;  %261 = vmatpush.msra.mxu3 %v189_v28  ;;  %v44_v36 = vld [vmem:[%s1134_s1 + $0x80] sm:$0xff]  ;;  %v42_v37 = vld [vmem:[%s1134_s1 + $0x70] sm:$0xff]  ;;  %v37_v39 = vld [vmem:[%s1134_s1 + $0x48] sm:$0xff] }
   0xe   :  { %90 = vmatpush.msra.mxu0 %v55_v17  ;;  %136 = vmatpush.msra.mxu2 %v57_v19  ;;  %v183_v38 = vld [vmem:[%s1135_s3 + $0xc0] sm:$0xff]  ;;  %v41_v40 = vld [vmem:[%s1134_s1 + $0x68] sm:$0xff]  ;;  %v39_v41 = vld [vmem:[%s1134_s1 + $0x58] sm:$0xff] }
   0xf   :  { %113 = vmatpush.msra.mxu1 %v56_v21  ;;  %262 = vmatpush.msra.mxu3 %v187_v30  ;;  %v181_v42 = vld [vmem:[%s1135_s3 + $0xb0] sm:$0xff]  ;;  %v36_v45 = vld [vmem:[%s1134_s1 + $0x40] sm:$0xff]  ;;  %v31_v47 = vld [vmem:[%s1134_s1 + $0x18] sm:$0xff] }
  0x10   :  { %91 = vmatpush.msra.mxu0 %v52_v20  ;;  %137 = vmatpush.msra.mxu2 %v54_v22  ;;  %v34_v43 = vld [vmem:[%s1134_s1 + $0x30] sm:$0xff]  ;;  %v179_v46 = vld [vmem:[%s1135_s3 + $0xa0] sm:$0xff]  ;;  %v35_v48 = vld [vmem:[%s1134_s1 + $0x38] sm:$0xff] }
  0x11   :  { %114 = vmatpush.msra.mxu1 %v53_v24  ;;  %263 = vmatpush.msra.mxu3 %v185_v34  ;;  %v38_v44 = vld [vmem:[%s1134_s1 + $0x50] sm:$0xff]  ;;  %v33_v49 = vld [vmem:[%s1134_s1 + $0x28] sm:$0xff]  ;;  %v28_v51 = vld [vmem:[%s1134_s1] sm:$0xff] }
  0x12   :  { %92 = vmatpush.msra.mxu0 %v49_v23  ;;  %138 = vmatpush.msra.mxu2 %v51_v25  ;;  %v177_v50 = vld [vmem:[%s1135_s3 + $0x90] sm:$0xff]  ;;  %v32_v52 = vld [vmem:[%s1134_s1 + $0x20] sm:$0xff]  ;;  %v29_v55 = vld [vmem:[%s1134_s1 + $0x8] sm:$0xff] }
  0x13   :  { %115 = vmatpush.msra.mxu1 %v50_v27  ;;  %264 = vmatpush.msra.mxu3 %v183_v38  ;;  %v26_v53 = vld [vmem:[%s1136_s0] sm:$0xff]  ;;  %v30_v54 = vld [vmem:[%s1134_s1 + $0x10] sm:$0xff]  ;;  %v190_v58 = vld [vmem:[%s1135_s3 + $0xf8] sm:$0xff] }
  0x14   :  { %93 = vmatpush.msra.mxu0 %v46_v26  ;;  %139 = vmatpush.msra.mxu2 %v48_v29  ;;  %v175_v56 = vld [vmem:[%s1135_s3 + $0x80] sm:$0xff]  ;;  %v221_v57 = vld [vmem:[%s1135_s3 + $0x1f0] sm:$0xff]  ;;  %v188_v62 = vld [vmem:[%s1135_s3 + $0xe8] sm:$0xff] }
  0x15   :  { %116 = vmatpush.msra.mxu1 %v47_v32  ;;  %265 = vmatpush.msra.mxu3 %v181_v42  ;;  %v173_v59 = vld [vmem:[%s1135_s3 + $0x70] sm:$0xff]  ;;  %v219_v61 = vld [vmem:[%s1135_s3 + $0x1e0] sm:$0xff]  ;;  %v186_v2 = vld [vmem:[%s1135_s3 + $0xd8] sm:$0xff] }
  0x16   :  { %94 = vmatpush.msra.mxu0 %v43_v31  ;;  %140 = vmatpush.msra.mxu2 %v45_v33  ;;  %v253_v60 = vld [vmem:[%s1135_s3 + $0x2f0] sm:$0xff]  ;;  %v171_v63 = vld [vmem:[%s1135_s3 + $0x60] sm:$0xff]  ;;  %v27_v3 = vld [vmem:[%s1136_s0 + $0x8] sm:$0xff] }
  0x17   :  { %117 = vmatpush.msra.mxu1 %v44_v36  ;;  %266 = vmatpush.msra.mxu3 %v179_v46  ;;  %v251_v0 = vld [vmem:[%s1135_s3 + $0x2e0] sm:$0xff]  ;;  %v217_v1 = vld [vmem:[%s1135_s3 + $0x1d0] sm:$0xff]  ;;  %v184_v8 = vld [vmem:[%s1135_s3 + $0xc8] sm:$0xff] }
  0x18   :  { %95 = vmatpush.msra.mxu0 %v40_v35  ;;  %141 = vmatpush.msra.mxu2 %v42_v37  ;;  %v169_v4 = vld [vmem:[%s1135_s3 + $0x50] sm:$0xff]  ;;  %v215_v5 = vld [vmem:[%s1135_s3 + $0x1c0] sm:$0xff]  ;;  %v182_v12 = vld [vmem:[%s1135_s3 + $0xb8] sm:$0xff] }
  0x19   :  { %118 = vmatpush.msra.mxu1 %v41_v40  ;;  %267 = vmatpush.msra.mxu3 %v177_v50  ;;  %v167_v6 = vld [vmem:[%s1135_s3 + $0x40] sm:$0xff]  ;;  %v213_v7 = vld [vmem:[%s1135_s3 + $0x1b0] sm:$0xff]  ;;  %v180_v16 = vld [vmem:[%s1135_s3 + $0xa8] sm:$0xff] }
  0x1a   :  { %96 = vmatpush.msra.mxu0 %v37_v39  ;;  %142 = vmatpush.msra.mxu2 %v39_v41  ;;  %v165_v9 = vld [vmem:[%s1135_s3 + $0x30] sm:$0xff]  ;;  %v211_v11 = vld [vmem:[%s1135_s3 + $0x1a0] sm:$0xff]  ;;  %v178_v20 = vld [vmem:[%s1135_s3 + $0x98] sm:$0xff] }
  0x1b   :  { %119 = vmatpush.msra.mxu1 %v38_v44  ;;  %268 = vmatpush.msra.mxu3 %v175_v56  ;;  %v249_v10 = vld [vmem:[%s1135_s3 + $0x2d0] sm:$0xff]  ;;  %v163_v13 = vld [vmem:[%s1135_s3 + $0x20] sm:$0xff]  ;;  %v222_v23 = vld [vmem:[%s1135_s3 + $0x1f8] sm:$0xff] }
  0x1c   :  { %97 = vmatpush.msra.mxu0 %v34_v43  ;;  %143 = vmatpush.msra.mxu2 %v36_v45  ;;  %v247_v14 = vld [vmem:[%s1135_s3 + $0x2c0] sm:$0xff]  ;;  %v209_v15 = vld [vmem:[%s1135_s3 + $0x190] sm:$0xff]  ;;  %v176_v25 = vld [vmem:[%s1135_s3 + $0x88] sm:$0xff] }
  0x1d   :  { %120 = vmatpush.msra.mxu1 %v35_v48  ;;  %269 = vmatpush.msra.mxu3 %v173_v59  ;;  %v161_v17 = vld [vmem:[%s1135_s3 + $0x10] sm:$0xff]  ;;  %v207_v19 = vld [vmem:[%s1135_s3 + $0x180] sm:$0xff]  ;;  %v220_v27 = vld [vmem:[%s1135_s3 + $0x1e8] sm:$0xff] }
  0x1e   :  { %98 = vmatpush.msra.mxu0 %v31_v47  ;;  %144 = vmatpush.msra.mxu2 %v33_v49  ;;  %v245_v18 = vld [vmem:[%s1135_s3 + $0x2b0] sm:$0xff]  ;;  %v159_v21 = vld [vmem:[%s1135_s3] sm:$0xff]  ;;  %v174_v29 = vld [vmem:[%s1135_s3 + $0x78] sm:$0xff] }
  0x1f   :  { %121 = vmatpush.msra.mxu1 %v32_v52  ;;  %270 = vmatpush.msra.mxu3 %v171_v63  ;;  %v243_v22 = vld [vmem:[%s1135_s3 + $0x2a0] sm:$0xff]  ;;  %v205_v24 = vld [vmem:[%s1135_s3 + $0x170] sm:$0xff]  ;;  %v218_v31 = vld [vmem:[%s1135_s3 + $0x1d8] sm:$0xff] }
  0x20   :  { %99 = vmatpush.msra.mxu0 %v28_v51  ;;  %145 = vmatpush.msra.mxu2 %v30_v54  ;;  %v241_v26 = vld [vmem:[%s1135_s3 + $0x290] sm:$0xff]  ;;  %v203_v28 = vld [vmem:[%s1135_s3 + $0x160] sm:$0xff]  ;;  %v172_v33 = vld [vmem:[%s1135_s3 + $0x68] sm:$0xff] }
  0x21   :  { %100 = vmatmul.f32.vlgmr.msra.gmra.mxu0 %v26_v53  ;;  %146 = vmatmul.f32.vlgmr.msra.gmra.mxu2 %v26_v53  ;;  %v239_v30 = vld [vmem:[%s1135_s3 + $0x280] sm:$0xff]  ;;  %v201_v32 = vld [vmem:[%s1135_s3 + $0x150] sm:$0xff]  ;;  %v216_v34 = vld [vmem:[%s1135_s3 + $0x1c8] sm:$0xff] }
  0x22   :  { %122 = vmatpush.msra.mxu1 %v29_v55  ;;  %284 = vmatpush.msrb.mxu0 %v221_v57  ;;  %v199_v35 = vld [vmem:[%s1135_s3 + $0x140] sm:$0xff]  ;;  %v170_v36 = vld [vmem:[%s1135_s3 + $0x58] sm:$0xff]  ;;  %v197_v38 = vld [vmem:[%s1135_s3 + $0x130] sm:$0xff] }
  0x23   :  { %123 = vmatmul.f32.vlgmr.msra.gmra.mxu1 %v26_v53  ;;  %330 = vmatpush.msrb.mxu2 %v190_v58  ;;  %v214_v37 = vld [vmem:[%s1135_s3 + $0x1b8] sm:$0xff]  ;;  %v168_v39 = vld [vmem:[%s1135_s3 + $0x48] sm:$0xff]  ;;  %v195_v41 = vld [vmem:[%s1135_s3 + $0x120] sm:$0xff] }
  0x24   :  { %307 = vmatpush.msrb.mxu1 %v253_v60  ;;  %285 = vmatpush.msrb.mxu0 %v219_v61  ;;  %v212_v40 = vld [vmem:[%s1135_s3 + $0x1a8] sm:$0xff]  ;;  %v166_v42 = vld [vmem:[%s1135_s3 + $0x38] sm:$0xff]  ;;  %v193_v44 = vld [vmem:[%s1135_s3 + $0x110] sm:$0xff] }
  0x25   :  { %331 = vmatpush.msrb.mxu2 %v188_v62  ;;  %271 = vmatpush.msra.mxu3 %v169_v4  ;;  %v210_v43 = vld [vmem:[%s1135_s3 + $0x198] sm:$0xff]  ;;  %v208_v45 = vld [vmem:[%s1135_s3 + $0x188] sm:$0xff]  ;;  %v191_v46 = vld [vmem:[%s1135_s3 + $0x100] sm:$0xff] }
  0x26   :  { %308 = vmatpush.msrb.mxu1 %v251_v0  ;;  %286 = vmatpush.msrb.mxu0 %v217_v1  ;;  %v881_v47 = vld [vmem:[%s1135_s3 + $0x2f8] sm:$0xff]  ;;  %v204_v49 = vld [vmem:[%s1135_s3 + $0x168] sm:$0xff]  ;;  %v237_v53 = vld [vmem:[%s1135_s3 + $0x270] sm:$0xff] }
  0x27   :  { %332 = vmatpush.msrb.mxu2 %v186_v2  ;;  %272 = vmatpush.msra.mxu3 %v167_v6  ;;  %v206_v48 = vld [vmem:[%s1135_s3 + $0x178] sm:$0xff]  ;;  %v200_v51 = vld [vmem:[%s1135_s3 + $0x148] sm:$0xff]  ;;  %v235_v57 = vld [vmem:[%s1135_s3 + $0x260] sm:$0xff] }
  0x28   :  { %287 = vmatpush.msrb.mxu0 %v215_v5  ;;  %309 = vmatpush.msrb.mxu1 %v249_v10  ;;  %v202_v50 = vld [vmem:[%s1135_s3 + $0x158] sm:$0xff]  ;;  %v164_v54 = vld [vmem:[%s1135_s3 + $0x28] sm:$0xff]  ;;  %v233_v61 = vld [vmem:[%s1135_s3 + $0x250] sm:$0xff] }
  0x29   :  { %103 = vmatmul.f32.gmra.mxu0 %v27_v3  ;;  %149 = vmatmul.f32.gmra.mxu2 %v27_v3  ;;  %v198_v52 = vld [vmem:[%s1135_s3 + $0x138] sm:$0xff]  ;;  %v908_v55 = vld [vmem:[%s1135_s3 + $0x2e8] sm:$0xff]  ;;  %v231_v1 = vld [vmem:[%s1135_s3 + $0x240] sm:$0xff] }
  0x2a   :  { %288 = vmatpush.msrb.mxu0 %v213_v7  ;;  %333 = vmatpush.msrb.mxu2 %v184_v8  ;;  %v196_v56 = vld [vmem:[%s1135_s3 + $0x128] sm:$0xff]  ;;  %v162_v58 = vld [vmem:[%s1135_s3 + $0x18] sm:$0xff]  ;;  %v227_v5 = vld [vmem:[%s1135_s3 + $0x220] sm:$0xff] }
  0x2b   :  { %126 = vmatmul.f32.gmra.mxu1 %v27_v3  ;;  %273 = vmatpush.msra.mxu3 %v165_v9  ;;  %v923_v59 = vld [vmem:[%s1135_s3 + $0x2d8] sm:$0xff]  ;;  %v160_v62 = vld [vmem:[%s1135_s3 + $0x8] sm:$0xff]  ;;  %v229_v3 = vld [vmem:[%s1135_s3 + $0x230] sm:$0xff] }
  0x2c   :  { %289 = vmatpush.msrb.mxu0 %v211_v11  ;;  %334 = vmatpush.msrb.mxu2 %v182_v12  ;;  %v194_v60 = vld [vmem:[%s1135_s3 + $0x118] sm:$0xff]  ;;  %v938_v63 = vld [vmem:[%s1135_s3 + $0x2c8] sm:$0xff]  ;;  %v225_v7 = vld [vmem:[%s1135_s3 + $0x210] sm:$0xff] }
  0x2d   :  { %274 = vmatpush.msra.mxu3 %v163_v13  ;;  %310 = vmatpush.msrb.mxu1 %v247_v14  ;;  %v192_v0 = vld [vmem:[%s1135_s3 + $0x108] sm:$0xff]  ;;  %v950_v2 = vld [vmem:[%s1135_s3 + $0x2b8] sm:$0xff]  ;;  %v223_v9 = vld [vmem:[%s1135_s3 + $0x200] sm:$0xff] }
  0x2e   :  { %290 = vmatpush.msrb.mxu0 %v209_v15  ;;  %335 = vmatpush.msrb.mxu2 %v180_v16  ;;  %v959_v4 = vld [vmem:[%s1135_s3 + $0x2a8] sm:$0xff]  ;;  %v968_v6 = vld [vmem:[%s1135_s3 + $0x298] sm:$0xff] }
  0x2f   :  { %275 = vmatpush.msra.mxu3 %v161_v17  ;;  %311 = vmatpush.msrb.mxu1 %v245_v18  ;;  %v977_v8 = vld [vmem:[%s1135_s3 + $0x288] sm:$0xff]  ;;  %v986_v10 = vld [vmem:[%s1135_s3 + $0x278] sm:$0xff]  ;;  %v76_v17 = vld [vmem:[%s1137_s2] sm:$0x7] }
  0x30   :  { %291 = vmatpush.msrb.mxu0 %v207_v19  ;;  %336 = vmatpush.msrb.mxu2 %v178_v20  ;;  %v992_v11 = vld [vmem:[%s1135_s3 + $0x268] sm:$0xff]  ;;  %v998_v12 = vld [vmem:[%s1135_s3 + $0x258] sm:$0xff]  ;;  %v78_v19 = vperm.slane %v76_v17, 0  ;;  %v79_v20 = vperm.slane %v76_v17, 1 }
  0x31   :  { %276 = vmatpush.msra.mxu3 %v159_v21  ;;  %312 = vmatpush.msrb.mxu1 %v243_v22  ;;  %v1004_v13 = vld [vmem:[%s1135_s3 + $0x248] sm:$0xff]  ;;  %v1010_v14 = vld [vmem:[%s1135_s3 + $0x238] sm:$0xff] }
  0x32   :  { %292 = vmatpush.msrb.mxu0 %v205_v24  ;;  %337 = vmatpush.msrb.mxu2 %v176_v25  ;;  %v1016_v15 = vld [vmem:[%s1135_s3 + $0x228] sm:$0xff]  ;;  %v1022_v16 = vld [vmem:[%s1135_s3 + $0x218] sm:$0xff] }
  0x33   :  { %353 = vmatpush.msrb.mxu3 %v222_v23  ;;  %313 = vmatpush.msrb.mxu1 %v241_v26  ;;  %v1031_v18 = vld [vmem:[%s1135_s3 + $0x208] sm:$0xff]  ;;  %v80_v26 = vperm.slane %v76_v17, 2 }
  0x34   :  { %293 = vmatpush.msrb.mxu0 %v203_v28  ;;  %338 = vmatpush.msrb.mxu2 %v174_v29  ;;  %v414_v28 = vld [vmem:[%s1138_s5 + $0x78] sm:$0xff]  ;;  %v413_v29 = vld [vmem:[%s1138_s5 + $0x70] sm:$0xff] }
  0x35   :  { %354 = vmatpush.msrb.mxu3 %v220_v27  ;;  %314 = vmatpush.msrb.mxu1 %v239_v30 }
  0x36   :  { %294 = vmatpush.msrb.mxu0 %v201_v32  ;;  %339 = vmatpush.msrb.mxu2 %v172_v33 }
  0x37   :  { %355 = vmatpush.msrb.mxu3 %v218_v31  ;;  %315 = vmatpush.msrb.mxu1 %v237_v53  ;;  %v412_v31 = vld [vmem:[%s1138_s5 + $0x68] sm:$0xff]  ;;  %v401_v53 = vld [vmem:[%s1138_s5 + $0x10] sm:$0xff] }
  0x38   :  { %295 = vmatpush.msrb.mxu0 %v199_v35  ;;  %340 = vmatpush.msrb.mxu2 %v170_v36 }
  0x39   :  { %356 = vmatpush.msrb.mxu3 %v216_v34  ;;  %316 = vmatpush.msrb.mxu1 %v235_v57  ;;  %v421_v57 = vld [vmem:[%s1138_s5 + $0xb0] sm:$0xff] }
  0x3a   :  { %296 = vmatpush.msrb.mxu0 %v197_v38  ;;  %341 = vmatpush.msrb.mxu2 %v168_v39  ;;  %v411_v39 = vld [vmem:[%s1138_s5 + $0x60] sm:$0xff] }
  0x3b   :  { %357 = vmatpush.msrb.mxu3 %v214_v37  ;;  %317 = vmatpush.msrb.mxu1 %v233_v61  ;;  %v417_v61 = vld [vmem:[%s1138_s5 + $0x90] sm:$0xff] }
  0x3c   :  { %297 = vmatpush.msrb.mxu0 %v195_v41  ;;  %342 = vmatpush.msrb.mxu2 %v166_v42  ;;  %v410_v41 = vld [vmem:[%s1138_s5 + $0x58] sm:$0xff] }
  0x3d   :  { %358 = vmatpush.msrb.mxu3 %v212_v40  ;;  %318 = vmatpush.msrb.mxu1 %v231_v1 }
  0x3e   :  { %298 = vmatpush.msrb.mxu0 %v193_v44  ;;  %343 = vmatpush.msrb.mxu2 %v164_v54  ;;  %v400_v54 = vld [vmem:[%s1138_s5 + $0x8] sm:$0xff] }
  0x3f   :  { %359 = vmatpush.msrb.mxu3 %v210_v43  ;;  %319 = vmatpush.msrb.mxu1 %v229_v3  ;;  %v409_v43 = vld [vmem:[%s1138_s5 + $0x50] sm:$0xff] }
  0x40   :  { %299 = vmatpush.msrb.mxu0 %v191_v46  ;;  %344 = vmatpush.msrb.mxu2 %v162_v58  ;;  %v408_v46 = vld [vmem:[%s1138_s5 + $0x48] sm:$0xff] }
  0x41   :  { %360 = vmatpush.msrb.mxu3 %v208_v45  ;;  %320 = vmatpush.msrb.mxu1 %v227_v5  ;;  %v420_v58 = vld [vmem:[%s1138_s5 + $0xa8] sm:$0xff] }
  0x42   :  { %376 = vmatpush.msra.mxu0 %v881_v47  ;;  %345 = vmatpush.msrb.mxu2 %v160_v62  ;;  %v416_v62 = vld [vmem:[%s1138_s5 + $0x88] sm:$0xff] }
  0x43   :  { %361 = vmatpush.msrb.mxu3 %v206_v48  ;;  %321 = vmatpush.msrb.mxu1 %v225_v7  ;;  %v406_v48 = vld [vmem:[%s1138_s5 + $0x38] sm:$0xff] }
  0x44   :  { %377 = vmatpush.msra.mxu0 %v908_v55 }
  0x45   :  { %362 = vmatpush.msrb.mxu3 %v204_v49  ;;  %322 = vmatpush.msrb.mxu1 %v223_v9  ;;  %v405_v49 = vld [vmem:[%s1138_s5 + $0x30] sm:$0xff] }
  0x46   :  { %378 = vmatpush.msra.mxu0 %v923_v59 }
  0x47   :  { %363 = vmatpush.msrb.mxu3 %v202_v50  ;;  %434 = vmatpush.msra.mxu1 %v414_v28  ;;  %v404_v50 = vld [vmem:[%s1138_s5 + $0x28] sm:$0xff] }
  0x48   :  { %379 = vmatpush.msra.mxu0 %v938_v63 }
  0x49   :  { %364 = vmatpush.msrb.mxu3 %v200_v51  ;;  %435 = vmatpush.msra.mxu1 %v413_v29  ;;  %v403_v51 = vld [vmem:[%s1138_s5 + $0x20] sm:$0xff] }
  0x4a   :  { %380 = vmatpush.msra.mxu0 %v950_v2 }
  0x4b   :  { %365 = vmatpush.msrb.mxu3 %v198_v52  ;;  %436 = vmatpush.msra.mxu1 %v412_v31  ;;  %v402_v52 = vld [vmem:[%s1138_s5 + $0x18] sm:$0xff] }
  0x4c   :  { %381 = vmatpush.msra.mxu0 %v959_v4 }
  0x4d   :  { %366 = vmatpush.msrb.mxu3 %v196_v56  ;;  %437 = vmatpush.msra.mxu1 %v411_v39  ;;  %v422_v56 = vld [vmem:[%s1138_s5 + $0xb8] sm:$0xff] }
  0x4e   :  { %382 = vmatpush.msra.mxu0 %v968_v6  ;;  %465 = vmatpush.msra.mxu2 %v422_v56 }
  0x4f   :  { %367 = vmatpush.msrb.mxu3 %v194_v60  ;;  %438 = vmatpush.msra.mxu1 %v410_v41  ;;  %v418_v60 = vld [vmem:[%s1138_s5 + $0x98] sm:$0xff] }
  0x50   :  { %383 = vmatpush.msra.mxu0 %v977_v8  ;;  %466 = vmatpush.msra.mxu2 %v421_v57 }
  0x51   :  { %368 = vmatpush.msrb.mxu3 %v192_v0  ;;  %439 = vmatpush.msra.mxu1 %v409_v43  ;;  %v255_v0 = vld [vmem:[%s1140_s4] sm:$0x3] }
  0x52   :  { %384 = vmatpush.msra.mxu0 %v986_v10  ;;  %467 = vmatpush.msra.mxu2 %v420_v58 }
  0x53   :  { %440 = vmatpush.msra.mxu1 %v408_v46 }
  0x54   :  { %385 = vmatpush.msra.mxu0 %v992_v11 }
  0x56   :  { %386 = vmatpush.msra.mxu0 %v998_v12 }
  0x58   :  { %387 = vmatpush.msra.mxu0 %v1004_v13 }
  0x5a   :  { %388 = vmatpush.msra.mxu0 %v1010_v14 }
  0x5c   :  { %389 = vmatpush.msra.mxu0 %v1016_v15 }
  0x5e   :  { %390 = vmatpush.msra.mxu0 %v1022_v16 }
  0x60   :  { %391 = vmatpush.msra.mxu0 %v1031_v18 }
  0x9e   :  { %v101_v21 = vpop.f32.mrf.mxu0 }
  0x9f   :  { %v102_v22 = vadd.f32 %v101_v21, %v78_v19 }
  0xa0   :  { %v124_v23 = vpop.f32.mrf.mxu1 }
  0xa1   :  { %v153_v24 = vmax.f32 %v102_v22, 0.0  ;;  %v125_v25 = vadd.f32 %v124_v23, %v79_v20 }
  0xa3   :  { %277 = vmatmul.f32.vlgmr.msra.gmra.mxu3 %v153_v24  ;;  %346 = vmatmul.f32.vlgmr.msrb.gmra.mxu2 %v153_v24  ;;  %v154_v27 = vmax.f32 %v125_v25, 0.0 }
  0xa4   :  { %488 = vmatpush.msra.mxu3 %v881_v47  ;;  %v147_v30 = vpop.f32.mrf.mxu2  ;;  %v407_v47 = vld [vmem:[%s1138_s5 + $0x40] sm:$0xff] }
  0xa5   :  { %300 = vmatmul.f32.vlgmr.msrb.gmra.mxu0 %v154_v27  ;;  %v148_v33 = vadd.f32 %v147_v30, %v80_v26  ;;  %441 = vmatpush.msra.mxu1 %v407_v47 }
  0xa6   :  { %v104_v32 = vpop.f32.mrf.mxu0  ;;  %489 = vmatpush.msra.mxu3 %v908_v55  ;;  %v399_v55 = vld [vmem:[%s1138_s5] sm:$0xff] }
  0xa7   :  { %v105_v34 = vadd.f32 %v104_v32, %v78_v19  ;;  %v155_v35 = vmax.f32 %v148_v33, 0.0  ;;  %442 = vmatpush.msra.mxu1 %v406_v48 }
  0xa8   :  { %490 = vmatpush.msra.mxu3 %v923_v59  ;;  %v127_v36 = vpop.f32.mrf.mxu1  ;;  %v419_v59 = vld [vmem:[%s1138_s5 + $0xa0] sm:$0xff] }
  0xa9   :  { %v156_v37 = vmax.f32 %v105_v34, 0.0  ;;  %v128_v38 = vadd.f32 %v127_v36, %v79_v20  ;;  %323 = vmatmul.f32.vlgmr.msrb.gmra.mxu1 %v155_v35  ;;  %468 = vmatpush.msra.mxu2 %v419_v59 }
  0xaa   :  { %491 = vmatpush.msra.mxu3 %v938_v63  ;;  %443 = vmatpush.msra.mxu1 %v405_v49  ;;  %v415_v63 = vld [vmem:[%s1138_s5 + $0x80] sm:$0xff] }
  0xab   :  { %280 = vmatmul.f32.gmra.mxu3 %v156_v37  ;;  %349 = vmatmul.f32.gmra.mxu2 %v156_v37  ;;  %v157_v40 = vmax.f32 %v128_v38, 0.0 }
  0xac   :  { %492 = vmatpush.msra.mxu3 %v950_v2  ;;  %v150_v42 = vpop.f32.mrf.mxu2  ;;  %444 = vmatpush.msra.mxu1 %v404_v50  ;;  %v257_v2 = vperm.slane %v255_v0, 0 }
  0xad   :  { %303 = vmatmul.f32.gmra.mxu0 %v157_v40  ;;  %v151_v44 = vadd.f32 %v150_v42, %v80_v26  ;;  %469 = vmatpush.msra.mxu2 %v418_v60 }
  0xae   :  { %493 = vmatpush.msra.mxu3 %v959_v4  ;;  %445 = vmatpush.msra.mxu1 %v403_v51 }
  0xaf   :  { %v158_v45 = vmax.f32 %v151_v44, 0.0  ;;  %470 = vmatpush.msra.mxu2 %v417_v61 }
  0xb0   :  { %494 = vmatpush.msra.mxu3 %v968_v6  ;;  %446 = vmatpush.msra.mxu1 %v402_v52 }
  0xb1   :  { %326 = vmatmul.f32.gmra.mxu1 %v158_v45  ;;  %471 = vmatpush.msra.mxu2 %v416_v62 }
  0xb2   :  { %495 = vmatpush.msra.mxu3 %v977_v8  ;;  %447 = vmatpush.msra.mxu1 %v401_v53 }
  0xb3   :  { %369 = vmatmul.f32.vlgmr.msrb.gmra.mxu3 %v154_v27  ;;  %472 = vmatpush.msra.mxu2 %v415_v63  ;;  %v504_v27 = vld [vmem:[%s1139_s6] ss:$0 sm:$0xff] }
  0xb4   :  { %496 = vmatpush.msra.mxu3 %v986_v10  ;;  %448 = vmatpush.msra.mxu1 %v400_v54 }
  0xb5   :  { %392 = vmatmul.f32.vlgmr.msra.gmra.mxu0 %v155_v35 }
  0xb6   :  { %497 = vmatpush.msra.mxu3 %v992_v11  ;;  %449 = vmatpush.msra.mxu1 %v399_v55 }
  0xb8   :  { %498 = vmatpush.msra.mxu3 %v998_v12  ;;  %v258_v12 = vperm.slane %v255_v0, 1 }
  0xba   :  { %499 = vmatpush.msra.mxu3 %v1004_v13 }
  0xbb   :  { %372 = vmatmul.f32.gmra.mxu3 %v157_v40 }
  0xbc   :  { %500 = vmatpush.msra.mxu3 %v1010_v14 }
  0xbe   :  { %501 = vmatpush.msra.mxu3 %v1016_v15 }
  0xc0   :  { %502 = vmatpush.msra.mxu3 %v1022_v16 }
  0xc2   :  { %503 = vmatpush.msra.mxu3 %v1031_v18 }
  0xc3   :  { %395 = vmatmul.f32.vlgmr.msra.gmra.mxu3 %v158_v45 }
 0x122   :  { %v301_v1 = vpop.f32.mrf.mxu0 }
 0x126   :  { %v278_v3 = vpop.f32.mrf.mxu3  ;;  %v324_v5 = vpop.f32.mrf.mxu1 }
 0x127   :  { %v279_v4 = vadd.f32 %v278_v3, %v257_v2  ;;  %v347_v14 = vpop.f32.mrf.mxu2 }
 0x128   :  { %v348_v16 = vadd.f32 %v347_v14, %v258_v12 }
 0x129   :  { %v302_v6 = vadd.f32 %v301_v1, %v279_v4 }
 0x12a   :  { %v304_v8 = vpop.f32.mrf.mxu0 }
 0x12b   :  { %v325_v7 = vadd.f32 %v324_v5, %v302_v6 }
 0x12d   :  { %450 = vmatmul.f32.vlgmr.msra.gmra.mxu1 %v325_v7 }
 0x12e   :  { %v281_v9 = vpop.f32.mrf.mxu3  ;;  %v327_v11 = vpop.f32.mrf.mxu1 }
 0x12f   :  { %v282_v10 = vadd.f32 %v281_v9, %v257_v2  ;;  %v350_v22 = vpop.f32.mrf.mxu2 }
 0x130   :  { %v351_v23 = vadd.f32 %v350_v22, %v258_v12 }
 0x131   :  { %v305_v13 = vadd.f32 %v304_v8, %v282_v10 }
 0x132   :  { %v393_v18 = vpop.f32.mrf.mxu0 }
 0x133   :  { %v328_v15 = vadd.f32 %v327_v11, %v305_v13 }
 0x135   :  { %453 = vmatmul.f32.gmra.mxu1 %v328_v15 }
 0x136   :  { %v370_v17 = vpop.f32.mrf.mxu3 }
 0x137   :  { %v371_v19 = vadd.f32 %v370_v17, %v348_v16 }
 0x139   :  { %v394_v20 = vadd.f32 %v393_v18, %v371_v19 }
 0x13b   :  { %486 = vmatmul.msk.f32.vlgmr.msra.gmra.mxu2 %vm427_vm0, %v394_v20 }
 0x13e   :  { %v373_v21 = vpop.f32.mrf.mxu3 }
 0x13f   :  { %v374_v24 = vadd.f32 %v373_v21, %v351_v23 }
 0x146   :  { %v396_v25 = vpop.f32.mrf.mxu3 }
 0x147   :  { %v397_v26 = vadd.f32 %v396_v25, %v374_v24 }
 0x149   :  { %487 = vmatmul.msk.f32.gmra.mxu2 %vm427_vm0, %v397_v26 }
 0x1aa   :  { %v451_v28 = vpop.f32.mrf.mxu1 }
 0x1ab   :  { %v452_v29 = vadd.f32 %v504_v27, %v451_v28 }
 0x1b2   :  { %v454_v32 = vpop.f32.mrf.mxu1 }
 0x1b3   :  { %v455_v33 = vadd.f32 %v504_v27, %v454_v32 }
 0x1be   :  { %v474_v30 = vpop.f32.mrf.mxu2 }
 0x1bf   :  { %v475_v31 = vadd.f32 %v474_v30, %v452_v29 }
 0x1c1   :  { %480 = vst [vmem:[%s1141_s7] sm:$0xff] %v475_v31 }
 0x1cc   :  { %v477_v34 = vpop.f32.mrf.mxu2 }
 0x1cd   :  { %v478_v35 = vadd.f32 %v477_v34, %v455_v33 }
 0x1cf   :  { %481 = vst [vmem:[%s1141_s7 + $0x8] sm:$0xff] %v478_v35 }

</bundles_post_ra>
